<compile_context>
chip_gen: v6e
topology: v6e:2x2x1
jax: 0.10.0
libtpu: 0.0.40
codegen_flags: <defaults>
</compile_context>

<pallas_src>
import math

import jax
import jax.numpy as jnp
from jax import lax
from jax.experimental import pallas as pl
from jax.experimental.pallas import tpu as pltpu

LANES = 128
MAX_TILE_ROWS = 4096                 # 4096 * 128 * 4B = 2 MiB per input block
CHUNK_ROWS = 512                     # in-kernel sub-chunk (keeps temporaries small)
VMEM_LIMIT_BYTES = 32 * 1024 * 1024  # explicit scoped-VMEM request (safe on v5e/v6e/v7x)


def _sublane_pack(dtype):
    """Sublane packing: 8 rows for 4-byte, 16 for 2-byte, 32 for 1-byte dtypes."""
    return max(8, 32 // max(1, dtype.itemsize))


def _round_up(n, m):
    return ((n + m - 1) // m) * m


def _make_kernel(tile_rows, valid_rows, inner_steps, needs_mask):
    """Build the loss kernel, closing over trace-time tiling constants."""

    def kernel(xr_ref, x_ref, lat_ref, out_ref, acc_ref):
        c = pl.program_id(0)   # "parallel" core-split axis
        i = pl.program_id(1)   # "arbitrary" reduction axis

        @pl.when(i == 0)
        def _init():
            acc_ref[...] = jnp.zeros_like(acc_ref)

        # Row offset of this logical tile inside the (rows, 128) slab.  With a
        # clamped index_map, a duplicated trailing tile gets valid <= 0 and is
        # fully masked out.
        logical_tile = c * inner_steps + i
        tile_row0 = logical_tile * tile_rows

        # Partial MSE (reduction='sum') for this block, accumulated into an
        # (8, 128) vector (VPU adds only; no per-step XLU reduce, no per-step
        # scalar store in the serial chain).
        partial = jnp.zeros((8, LANES), jnp.float32)
        for start in range(0, tile_rows, CHUNK_ROWS):
            rows_c = min(CHUNK_ROWS, tile_rows - start)
            xr = xr_ref[pl.ds(start, rows_c), :]
            xx = x_ref[pl.ds(start, rows_c), :]
            if xr.dtype != jnp.float32:
                xr = xr.astype(jnp.float32)
            if xx.dtype != jnp.float32:
                xx = xx.astype(jnp.float32)
            diff = xr - xx
            if needs_mask:
                row_ids = lax.broadcasted_iota(jnp.int32, (rows_c, LANES), 0) + start
                valid = valid_rows - tile_row0
                diff = jnp.where(row_ids < valid, diff, 0.0)
            d2 = diff * diff
            partial = partial + jnp.sum(d2.reshape(rows_c // 8, 8, LANES), axis=0)
        acc_ref[...] += partial

        @pl.when(i == inner_steps - 1)
        def _finalize():
            out_ref[...] = jnp.zeros_like(out_ref) + jnp.sum(acc_ref[...])

        # The tiny KLD term is added exactly once, by grid slice c == 0.
        @pl.when(jnp.logical_and(c == 0, i == inner_steps - 1))
        def _add_kld():
            mu = lat_ref[0]
            lv = lat_ref[1]
            if mu.dtype != jnp.float32:
                mu = mu.astype(jnp.float32)
            if lv.dtype != jnp.float32:
                lv = lv.astype(jnp.float32)
            # Zero-padded (mu=0, logvar=0) entries contribute 1 + 0 - 0 - 1 = 0.
            kld = -0.5 * jnp.sum(1.0 + lv - mu * mu - jnp.exp(lv))
            out_ref[...] += kld

    return kernel


def custom_loss(x_recon, x, mu, logvar, epoch=None):
    """Pallas equivalent of customLoss.forward (epoch is unused, as in PyTorch)."""
    assert x_recon.shape == x.shape
    assert mu.shape == logvar.shape

    n_elem = math.prod(x.shape)
    pack = max(_sublane_pack(x_recon.dtype), _sublane_pack(x.dtype))

    # ---- x_recon / x -> lane-dense (rows, 128) views (no copy if possible) ---
    padded_elems = max(pack * LANES, _round_up(n_elem, LANES))
    rows = padded_elems // LANES

    def as_rows(a):
        flat = a.reshape(-1)
        if padded_elems != n_elem:       # pad only when strictly unavoidable
            flat = jnp.pad(flat, (0, padded_elems - n_elem))
        return flat.reshape(rows, LANES)

    xr2 = as_rows(x_recon)
    x2 = as_rows(x)

    tile_rows = min(MAX_TILE_ROWS, (rows // pack) * pack)
    total_tiles = pl.cdiv(rows, tile_rows)

    # Split the reduction across both TensorCores on v7x; serializes on 1-TC chips.
    ncores = 2 if total_tiles >= 2 else 1
    inner = pl.cdiv(total_tiles, ncores)
    # Row-mask needed if the last tile is ragged, or a trailing tile is duplicated
    # (index clamped) to keep every DMA in bounds.
    needs_mask = (rows % tile_rows != 0) or (total_tiles % ncores != 0)

    if total_tiles % ncores == 0:
        def recon_map(c, i):
            return (c * inner + i, 0)
    else:
        def recon_map(c, i):
            # Clamp so the duplicated trailing tile never DMAs out of bounds;
            # the kernel masks its contribution to zero.
            return (jnp.minimum(c * inner + i, total_tiles - 1), 0)

    # ---- mu / logvar -> one packed, zero-padded (2, Lr, 128) resident slab ----
    n_lat = math.prod(mu.shape)
    lat_pad = _round_up(max(n_lat, 1), LANES)

    def lat_flat(a):
        flat = a.reshape(-1)
        if lat_pad != n_lat:
            flat = jnp.pad(flat, (0, lat_pad - n_lat))
        return flat

    lat_rows = lat_pad // LANES
    latent = jnp.stack([lat_flat(mu), lat_flat(logvar)]).reshape(2, lat_rows, LANES)

    cost = pl.CostEstimate(
        flops=3 * n_elem + 6 * n_lat,
        transcendentals=n_lat,
        bytes_accessed=(n_elem * (x_recon.dtype.itemsize + x.dtype.itemsize)
                        + n_lat * (mu.dtype.itemsize + logvar.dtype.itemsize)
                        + 4 * ncores),
    )

    kernel = _make_kernel(tile_rows, rows, inner, needs_mask)

    partials = pl.pallas_call(
        kernel,
        out_shape=jax.ShapeDtypeStruct((ncores, 1, 1), jnp.float32),
        grid=(ncores, inner),
        in_specs=[
            pl.BlockSpec((tile_rows, LANES), recon_map),
            pl.BlockSpec((tile_rows, LANES), recon_map),
            # Resident latent slab (constant block index across the grid).
            pl.BlockSpec((2, lat_rows, LANES), lambda c, i: (0, 0, 0)),
        ],
        # One (1,1,1) partial per core slice; resident across the reduction axis.
        out_specs=pl.BlockSpec((1, 1, 1), lambda c, i: (c, 0, 0)),
        scratch_shapes=[pltpu.VMEM((8, LANES), jnp.float32)],
        compiler_params=pltpu.CompilerParams(
            dimension_semantics=("parallel", "arbitrary"),
            vmem_limit_bytes=VMEM_LIMIT_BYTES,
        ),
        cost_estimate=cost,
    )(xr2, x2, latent)

    # Sum the per-core partials (the KLD was folded into the c == 0 partial).
    return jnp.sum(partials)


def _reference(x_recon, x, mu, logvar):
    loss_mse = jnp.sum((x_recon - x) ** 2)
    loss_kld = -0.5 * jnp.sum(1.0 + logvar - mu**2 - jnp.exp(logvar))
    return loss_mse + loss_kld


if __name__ == "__main__":
    key = jax.random.PRNGKey(0)
    k1, k2, k3, k4 = jax.random.split(key, 4)

    # Small shapes consistent with a VAE forward: images (N,C,H,W), latent (N,Z).
    x_recon = jax.random.normal(k1, (2, 4, 16, 16), dtype=jnp.float32)
    x = jax.random.normal(k2, (2, 4, 16, 16), dtype=jnp.float32)
    mu = jax.random.normal(k3, (2, 32), dtype=jnp.float32)
    logvar = jax.random.normal(k4, (2, 32), dtype=jnp.float32) * 0.1
    epoch = 0  # unused by the loss, kept for signature parity

    loss = custom_loss(x_recon, x, mu, logvar, epoch)
    jax.block_until_ready(loss)
    ref = _reference(x_recon, x, mu, logvar)
    assert jnp.allclose(loss, ref, rtol=1e-5, atol=1e-5), (loss, ref)

    # Also exercise the multi-tile / ragged-edge / per-core-partial path.
    k5, k6 = jax.random.split(k1)
    xr_b = jax.random.normal(k5, (2, 4, 30, 30), dtype=jnp.float32)
    x_b = jax.random.normal(k6, (2, 4, 30, 30), dtype=jnp.float32)
    loss_b = custom_loss(xr_b, x_b, mu, logvar, epoch)
    jax.block_until_ready(loss_b)
    ref_b = _reference(xr_b, x_b, mu, logvar)
    assert jnp.allclose(loss_b, ref_b, rtol=1e-5, atol=1e-5), (loss_b, ref_b)

    print("KERNEL_OK")
</pallas_src>

<mosaic_0001>
module attributes {stable_mosaic.version = 11 : i64} {
  func.func @kernel(%arg0: i32, %arg1: i32, %arg2: memref<16x128xf32, #tpu.memory_space<vmem>>, %arg3: memref<16x128xf32, #tpu.memory_space<vmem>>, %arg4: memref<2x1x128xf32, #tpu.memory_space<vmem>>, %arg5: memref<1x1x1xf32, #tpu.memory_space<vmem>>, %arg6: memref<8x128xf32, #tpu.memory_space<vmem>>) attributes {dimension_semantics = [#tpu.dimension_semantics<parallel>, #tpu.dimension_semantics<arbitrary>], iteration_bounds = array<i64: 1, 1>, scalar_prefetch = 0 : i64, scratch_operands = 1 : i64, tpu.core_type = #tpu.core_type<tc>, window_params = [{transform_indices = @transform_0, window_bounds = array<i64: 16, 128>}, {transform_indices = @transform_1, window_bounds = array<i64: 16, 128>}, {pipeline_mode = #tpu.pipeline_mode<synchronous>, transform_indices = @transform_2, window_bounds = array<i64: 2, 1, 128>}, {transform_indices = @transform_3, window_bounds = array<i64: 1, 1, 1>}]} {
    %c0_i32 = arith.constant 0 : i32
    %0 = arith.cmpi eq, %arg1, %c0_i32 : i32
    %1 = arith.extui %0 : i1 to i32
    %c0_i32_0 = arith.constant 0 : i32
    %2 = arith.cmpi ne, %1, %c0_i32_0 : i32
    scf.if %2 {
      %cst_14 = arith.constant 0.000000e+00 : f32
      %22 = vector.broadcast %cst_14 : f32 to vector<8x128xf32>
      %c0_15 = arith.constant 0 : index
      %c0_16 = arith.constant 0 : index
      %23 = vector.load %arg6[%c0_15, %c0_16] : memref<8x128xf32, #tpu.memory_space<vmem>>, vector<8x128xf32>
      tpu.vector_store %arg6[%c0_15, %c0_16], %22 {strides = array<i32>} : memref<8x128xf32, #tpu.memory_space<vmem>>, vector<8x128xf32>,
    } else {
    }
    %cst = arith.constant 0.000000e+00 : f32
    %3 = vector.broadcast %cst : f32 to vector<8x128xf32>
    %c0 = arith.constant 0 : index
    %c0_1 = arith.constant 0 : index
    %4 = vector.load %arg2[%c0, %c0_1] : memref<16x128xf32, #tpu.memory_space<vmem>>, vector<16x128xf32>
    %c0_2 = arith.constant 0 : index
    %c0_3 = arith.constant 0 : index
    %5 = vector.load %arg3[%c0_2, %c0_3] : memref<16x128xf32, #tpu.memory_space<vmem>>, vector<16x128xf32>
    %6 = arith.subf %4, %5 : vector<16x128xf32>
    %7 = arith.mulf %6, %6 : vector<16x128xf32>
    %8 = vector.shape_cast %7 : vector<16x128xf32> to vector<2x8x128xf32>
    %cst_4 = arith.constant dense<0.000000e+00> : vector<8x128xf32>
    %9 = vector.multi_reduction <add>, %8, %cst_4 [0] : vector<2x8x128xf32> to vector<8x128xf32>
    %10 = arith.addf %3, %9 : vector<8x128xf32>
    %c0_5 = arith.constant 0 : index
    %c0_6 = arith.constant 0 : index
    %11 = vector.load %arg6[%c0_5, %c0_6] : memref<8x128xf32, #tpu.memory_space<vmem>>, vector<8x128xf32>
    %12 = arith.addf %11, %10 : vector<8x128xf32>
    %c0_7 = arith.constant 0 : index
    %c0_8 = arith.constant 0 : index
    %13 = vector.load %arg6[%c0_7, %c0_8] : memref<8x128xf32, #tpu.memory_space<vmem>>, vector<8x128xf32>
    tpu.vector_store %arg6[%c0_7, %c0_8], %12 {strides = array<i32>} : memref<8x128xf32, #tpu.memory_space<vmem>>, vector<8x128xf32>,
    %c0_i32_9 = arith.constant 0 : i32
    %14 = arith.cmpi eq, %arg1, %c0_i32_9 : i32
    %15 = arith.extui %14 : i1 to i32
    %c0_i32_10 = arith.constant 0 : i32
    %16 = arith.cmpi ne, %15, %c0_i32_10 : i32
    scf.if %16 {
      %cst_14 = arith.constant 0.000000e+00 : f32
      %22 = vector.broadcast %cst_14 : f32 to vector<1x1x1xf32>
      %c0_15 = arith.constant 0 : index
      %c0_16 = arith.constant 0 : index
      %23 = vector.load %arg6[%c0_15, %c0_16] : memref<8x128xf32, #tpu.memory_space<vmem>>, vector<8x128xf32>
      %24 = vector.shape_cast %23 : vector<8x128xf32> to vector<1x8x128xf32>
      %cst_17 = arith.constant dense<0.000000e+00> : vector<1xf32>
      %25 = vector.multi_reduction <add>, %24, %cst_17 [1, 2] : vector<1x8x128xf32> to vector<1xf32>
      %26 = vector.shape_cast %25 : vector<1xf32> to vector<1x1x1xf32>
      %27 = vector.extract %26[0, 0, 0] : f32 from vector<1x1x1xf32>
      %28 = vector.broadcast %27 : f32 to vector<1x1x1xf32>
      %29 = arith.addf %22, %28 : vector<1x1x1xf32>
      %c0_18 = arith.constant 0 : index
      %c0_19 = arith.constant 0 : index
      %c0_20 = arith.constant 0 : index
      %30 = vector.load %arg5[%c0_18, %c0_19, %c0_20] : memref<1x1x1xf32, #tpu.memory_space<vmem>>, vector<1x1x1xf32>
      tpu.vector_store %arg5[%c0_18, %c0_19, %c0_20], %29 {strides = array<i32>} : memref<1x1x1xf32, #tpu.memory_space<vmem>>, vector<1x1x1xf32>,
    } else {
    }
    %c0_i32_11 = arith.constant 0 : i32
    %17 = arith.cmpi eq, %arg0, %c0_i32_11 : i32
    %c0_i32_12 = arith.constant 0 : i32
    %18 = arith.cmpi eq, %arg1, %c0_i32_12 : i32
    %19 = arith.andi %17, %18 : i1
    %20 = arith.extui %19 : i1 to i32
    %c0_i32_13 = arith.constant 0 : i32
    %21 = arith.cmpi ne, %20, %c0_i32_13 : i32
    scf.if %21 {
      %c0_14 = arith.constant 0 : index
      %c0_15 = arith.constant 0 : index
      %c0_16 = arith.constant 0 : index
      %22 = vector.load %arg4[%c0_14, %c0_15, %c0_16] : memref<2x1x128xf32, #tpu.memory_space<vmem>>, vector<1x1x128xf32>
      %23 = vector.shape_cast %22 : vector<1x1x128xf32> to vector<1x128xf32>
      %c1 = arith.constant 1 : index
      %c0_17 = arith.constant 0 : index
      %c0_18 = arith.constant 0 : index
      %24 = vector.load %arg4[%c1, %c0_17, %c0_18] : memref<2x1x128xf32, #tpu.memory_space<vmem>>, vector<1x1x128xf32>
      %25 = vector.shape_cast %24 : vector<1x1x128xf32> to vector<1x128xf32>
      %cst_19 = arith.constant 1.000000e+00 : f32
      %26 = vector.broadcast %cst_19 : f32 to vector<1x128xf32>
      %27 = arith.addf %26, %25 : vector<1x128xf32>
      %28 = arith.mulf %23, %23 : vector<1x128xf32>
      %29 = arith.subf %27, %28 : vector<1x128xf32>
      %30 = math.exp %25 : vector<1x128xf32>
      %31 = arith.subf %29, %30 : vector<1x128xf32>
      %32 = vector.shape_cast %31 : vector<1x128xf32> to vector<1x1x128xf32>
      %cst_20 = arith.constant dense<0.000000e+00> : vector<1xf32>
      %33 = vector.multi_reduction <add>, %32, %cst_20 [1, 2] : vector<1x1x128xf32> to vector<1xf32>
      %34 = vector.shape_cast %33 : vector<1xf32> to vector<1x1x1xf32>
      %35 = vector.extract %34[0, 0, 0] : f32 from vector<1x1x1xf32>
      %cst_21 = arith.constant -5.000000e-01 : f32
      %36 = arith.mulf %cst_21, %35 : f32
      %c0_22 = arith.constant 0 : index
      %c0_23 = arith.constant 0 : index
      %c0_24 = arith.constant 0 : index
      %37 = vector.load %arg5[%c0_22, %c0_23, %c0_24] : memref<1x1x1xf32, #tpu.memory_space<vmem>>, vector<1x1x1xf32>
      %38 = vector.broadcast %36 : f32 to vector<1x1x1xf32>
      %39 = arith.addf %37, %38 : vector<1x1x1xf32>
      %c0_25 = arith.constant 0 : index
      %c0_26 = arith.constant 0 : index
      %c0_27 = arith.constant 0 : index
      %40 = vector.load %arg5[%c0_25, %c0_26, %c0_27] : memref<1x1x1xf32, #tpu.memory_space<vmem>>, vector<1x1x1xf32>
      tpu.vector_store %arg5[%c0_25, %c0_26, %c0_27], %39 {strides = array<i32>} : memref<1x1x1xf32, #tpu.memory_space<vmem>>, vector<1x1x1xf32>,
    } else {
    }
    return
  }
  func.func @transform_0(%arg0: i32, %arg1: i32) -> (i32, i32) {
    %c1_i32 = arith.constant 1 : i32
    %0 = arith.muli %arg0, %c1_i32 : i32
    %1 = arith.addi %0, %arg1 : i32
    %c0_i32 = arith.constant 0 : i32
    %c0_i32_0 = arith.constant 0 : i32
    return %1, %c0_i32 : i32, i32
  }
  func.func @transform_1(%arg0: i32, %arg1: i32) -> (i32, i32) {
    %c1_i32 = arith.constant 1 : i32
    %0 = arith.muli %arg0, %c1_i32 : i32
    %1 = arith.addi %0, %arg1 : i32
    %c0_i32 = arith.constant 0 : i32
    %c0_i32_0 = arith.constant 0 : i32
    return %1, %c0_i32 : i32, i32
  }
  func.func @transform_2(%arg0: i32, %arg1: i32) -> (i32, i32, i32) {
    %c0_i32 = arith.constant 0 : i32
    %c0_i32_0 = arith.constant 0 : i32
    %c0_i32_1 = arith.constant 0 : i32
    %c0_i32_2 = arith.constant 0 : i32
    return %c0_i32, %c0_i32_0, %c0_i32_1 : i32, i32, i32
  }
  func.func @transform_3(%arg0: i32, %arg1: i32) -> (i32, i32, i32) {
    %c0_i32 = arith.constant 0 : i32
    %c0_i32_0 = arith.constant 0 : i32
    %c0_i32_1 = arith.constant 0 : i32
    return %arg0, %c0_i32, %c0_i32_0 : i32, i32, i32
  }
}

</mosaic_0001>

<bundles_post_ra>
// kernel: tpu_custom_call.1
= control target key start
LH: loop header
LB: loop body
LE: loop exit
PB: predicated region body
PF: predicated region fallthrough
CT: control target
= control target key end

     0   :  { %8 = vsyncpa [#allocation4], 0  ;;  %s255_s0 = inlined_call_operand.hbm [shape: f32[16,128], index: 0, kind: input, shape index: {}]   ;;  %s256_s1 = inlined_call_operand.hbm [shape: f32[16,128], index: 1, kind: input, shape index: {}]   ;;  %s257_s2 = inlined_call_operand.vmem [shape: f32[2,1,128], index: 2, kind: input, shape index: {}]   ;;  %s258_s3 = inlined_call_operand.hbm [shape: f32[1,1,1], index: 3, kind: output, shape index: {}]  }
   0x1   :  { %9 = vsyncpa [#allocation7], 0 }
   0x2   :  { %10 = vsyncpa [#allocation5], 0  ;;  %s215_s12 = smov [#allocation3]  }
   0x3   :  { %s20_s13 = sshll.u32 %s215_s12, 4  ;;  %s21_s13 = int_to_ptr.vmem [resolvable:$true] %s20_s13 }
   0x4   :  { %s157_s14 = scalar_lea.vmem %s21_s13, 256  ;;  %p162_p1 = scmp.lt.s32.totalorder %s21_s13, %s21_s13 }
   0x5   :  { %p158_p0 = scmp.ne.s32.totalorder %s21_s13, %s157_s14  ;;  %p163_p2 = scmp.lt.s32.totalorder %s157_s14, %s157_s14 }
   0x7   :  { %p164_p3 = por %p163_p2, %p162_p1 }
   0x9   :  { %p165_p4 = pnand %p164_p3, %p158_p0 }
   0xb   :  { %168 = shalt.err (!%p165_p4)
}
   0xc   :  { %s216_s15 = smov 128   ;;  %s217_s16 = smov 8  }
   0xd   :  { %26 = dma.hbm_to_vmem [thread:$0]  %s255_s0, 256, %s21_s13, [#allocation4], %s216_s15, %s216_s15, %s217_s16  }
   0xe   :  { %s218_s19 = smov [#allocation6]  }
   0xf   :  { %s36_s20 = sshll.u32 %s218_s19, 4  ;;  %s37_s20 = int_to_ptr.vmem [resolvable:$true] %s36_s20 }
  0x10   :  { %s177_s21 = scalar_lea.vmem %s37_s20, 256  ;;  %p182_p6 = scmp.lt.s32.totalorder %s37_s20, %s37_s20 }
  0x11   :  { %p178_p5 = scmp.ne.s32.totalorder %s37_s20, %s177_s21  ;;  %p183_p7 = scmp.lt.s32.totalorder %s177_s21, %s177_s21 }
  0x13   :  { %p184_p8 = por %p183_p7, %p182_p6 }
  0x15   :  { %p185_p9 = pnand %p184_p8, %p178_p5 }
  0x17   :  { %188 = shalt.err (!%p185_p9)
}
  0x18   :  { %42 = dma.hbm_to_vmem [thread:$0]  %s256_s1, 256, %s37_s20, [#allocation7], %s216_s15, %s216_s15, %s217_s16  }
  0x19   :  { %209 = dma.done.wait [#allocation4], 256  }
  0x1a   :  { %210 = vsyncadd [#allocation4], 4294967040 }
  0x1b   :  { %211 = dma.done.wait [#allocation7], 256  }
  0x1c   :  { %212 = vsyncadd [#allocation7], 4294967040  ;;  %v60_v0 = vld [vmem:[#allocation3] sm:$0xff]  ;;  %v61_v1 = vld [vmem:[#allocation3 + $0x8] sm:$0xff]  ;;  %vm104_vm0 = vcmask 1040384   ;;  %vm88_vm1 = vcmask 0  }
  0x1d   :  { %v62_v2 = vld [vmem:[#allocation6] sm:$0xff]  ;;  %v63_v3 = vld [vmem:[#allocation6 + $0x8] sm:$0xff]  ;;  %v137_v5 = vld [vmem:[%s257_s2 + $0x1] sm:$0x1]  ;;  %s219_s28 = smov [#allocation8]  }
  0x1e   :  { %v64_v4 = vsub.f32 %v60_v0, %v62_v2  ;;  %v65_v6 = vsub.f32 %v61_v1, %v63_v3  ;;  %v101_v7 = vmul.f32 1.442695, %v137_v5  ;;  %v95_v11 = vld [vmem:[%s257_s2] sm:$0x1]  ;;  %v98_v12 = vadd.f32 1.0, %v137_v5  ;;  %s127_s29 = sshll.u32 %s219_s28, 4  ;;  %s128_s29 = int_to_ptr.vmem [resolvable:$true] %s127_s29 }
  0x1f   :  { %v99_v13 = vmul.f32 %v95_v11, %v95_v11  ;;  %s189_s30 = scalar_lea.vmem %s128_s29, 16  ;;  %s193_s4 = scalar_lea.vmem %s128_s29, 32 }
  0x20   :  { %v66_v8 = vmul.f32 %v64_v4, %v64_v4  ;;  %v67_v9 = vmul.f32 %v65_v6, %v65_v6  ;;  %147 = vpow2.f32 %v101_v7  ;;  %p190_p10 = scmp.ne.s32.totalorder %s128_s29, %s189_s30  ;;  %p194_p11 = scmp.lt.s32.totalorder %s128_s29, %s128_s29 }
  0x21   :  { %v100_v14 = vsub.f32 %v98_v12, %v99_v13  ;;  %p195_p12 = scmp.lt.s32.totalorder %s193_s4, %s189_s30 }
  0x22   :  { %v68_v10 = vadd.f32 %v67_v9, %v66_v8 }
  0x23   :  { %p196_p13 = por %p195_p12, %p194_p11 }
  0x24   :  { %77 = vadd.xlane.f32.xlu0 %v68_v10 }
  0x25   :  { %p197_p0 = pnand %p196_p13, %p190_p10 }
  0x2d   :  { %v148_v15 = vpop.eup %147 }
  0x2e   :  { %v103_v16 = vsub.f32 %v100_v14, %v148_v15 }
  0x30   :  { %v105_v17 = vsel %vm104_vm0, %v103_v16, 0.0 }
  0x31   :  { %106 = vadd.xlane.f32.xlu0 %v105_v17 }
  0xad   :  { %v78_v18 = vpop.xlane.xlu0 %77 }
  0xae   :  { %v79_v19 = vrot.slane %v78_v18, 4 }
  0xb0   :  { %v80_v20 = vadd.f32 %v79_v19, %v78_v18 }
  0xb2   :  { %v81_v21 = vrot.slane %v80_v20, 2 }
  0xb4   :  { %v82_v22 = vadd.f32 %v81_v21, %v80_v20 }
  0xb6   :  { %v83_v23 = vrot.slane %v82_v22, 1 }
  0xb8   :  { %v84_v24 = vadd.f32 %v83_v23, %v82_v22 }
  0xba   :  { %v107_v25 = vpop.xlane.xlu0 %106  ;;  %138 = vpush %v84_v24 }
  0xbb   :  { %v108_v26 = vrot.slane %v107_v25, 4 }
  0xbd   :  { %v109_v27 = vadd.f32 %v108_v26, %v107_v25 }
  0xbf   :  { %v110_v28 = vrot.slane %v109_v27, 2 }
  0xc1   :  { %v111_v29 = vadd.f32 %v110_v28, %v109_v27 }
  0xc3   :  { %v112_v30 = vrot.slane %v111_v29, 1 }
  0xc5   :  { %v113_v31 = vadd.f32 %v112_v30, %v111_v29 }
  0xc7   :  { %140 = vpush %v113_v31 }
  0xeb   :  { %s139_s2 = spop %138 }
  0xec   :  { %v86_v32 = vstv %s139_s2 }
  0xed   :  { %89 = vst.msk [vmem:[#allocation8] sm:$0x1] %vm88_vm1, %v86_v32 }
  0xf4   :  { %v116_v33 = vld [vmem:[#allocation8] sm:$0x1] }
  0xf8   :  { %s141_s26 = spop %140 }
  0xf9   :  { %s115_s27 = smul.f32 -0.5, %s141_s26 }
  0xfb   :  { %v117_v34 = vstv %s115_s27 }
  0xfc   :  { %v118_v35 = vadd.f32 %v117_v34, %v116_v33 }
  0xfe   :  { %120 = vst.msk [vmem:[#allocation8] sm:$0x1] %vm88_vm1, %v118_v35 }
  0xff   :  { %200 = shalt.err (!%p197_p0)
}
 0x100   :  { %130 = dma.vmem_to_hbm [thread:$0]  %s128_s29, 16, %s258_s3, [#allocation5]  }
 0x101   :  { %213 = dma.done.wait [#allocation5], 16  }
 0x102   :  { %214 = vsyncadd [#allocation5], 4294967280 }
 0x103   :  { %134 = vsyncpa [#allocation4], 1 }
 0x104   :  { %135 = vsyncpa [#allocation7], 1 }
 0x105   :  { %136 = vsyncpa [#allocation5], 1 }

</bundles_post_ra>
